<compile_context>
chip_gen: v5e
topology: v5e:2x2
jax: 0.10.0
libtpu: 0.0.40
codegen_flags: <defaults>
</compile_context>

<pallas_src>
import functools

import jax
import jax.numpy as jnp
from jax.experimental import pallas as pl
from jax.experimental.pallas import tpu as pltpu


# --------------------------------------------------------------------------- #
# pltpu.roll direction probe (resolved once, eagerly, outside any jit trace).
# --------------------------------------------------------------------------- #
def _roll_probe_kernel(x_ref, o_ref):
    o_ref[...] = pltpu.roll(x_ref[...], 1, 1)


@functools.lru_cache(maxsize=None)
def _pltpu_roll_sign():
    """Returns sign s.t. pltpu.roll(x, (sign * off) % n, axis)[p] == x[(p + off) % n]."""
    x = jnp.arange(128.0, dtype=jnp.float32).reshape(1, 128)
    y = pl.pallas_call(
        _roll_probe_kernel,
        out_shape=jax.ShapeDtypeStruct((1, 128), jnp.float32),
    )(x)
    # np.roll semantics: roll(x, 1)[0] == 127 -> need shift = -off.
    return -1 if float(y[0, 0]) == 127.0 else 1


# --------------------------------------------------------------------------- #
# In-kernel helpers.
# --------------------------------------------------------------------------- #
def _conv3x3_flat(maps, w_taps_ref, *, H, W, roll_sign):
    """'same' 3x3 conv (no bias) on row-major flattened maps.

    maps:       (Cin, H*W) f32, pixel p = h * W + w on the lane axis.
    w_taps_ref: (9, Cout, Cin) ref, tap k = dy * 3 + dx.
    returns     (Cout, H*W) f32.
    """
    HW = H * W
    cout = w_taps_ref.shape[1]
    lane = jax.lax.broadcasted_iota(jnp.int32, (1, HW), 1)
    h_pix = lane // W
    w_pix = lane % W

    acc = jnp.zeros((cout, HW), jnp.float32)
    for dy in range(3):
        for dx in range(3):
            off = (dy - 1) * W + (dx - 1)
            if off == 0:
                shifted = maps
            else:
                # shifted[p] = maps[p + off]; wrap-around lanes are masked below.
                shifted = pltpu.roll(maps, (roll_sign * off) % HW, 1)
            h_in = h_pix + (dy - 1)
            w_in = w_pix + (dx - 1)
            valid = (h_in >= 0) & (h_in < H) & (w_in >= 0) & (w_in < W)
            shifted = jnp.where(valid, shifted, 0.0)
            acc = acc + jnp.dot(w_taps_ref[dy * 3 + dx], shifted,
                                preferred_element_type=jnp.float32)
    return acc


def _grid_sample_channel(x_wh, off_h_c, off_w_c, grid_h, grid_w, *, H, W):
    """Bilinear grid_sample of one channel (zeros padding, align_corners=False).

    x_wh:              (W, H) transposed input map (so the MXU contracts over H).
    off_h_c / off_w_c: (1, H*W) offsets; off_h drives the x/width coordinate,
                       off_w the y/height coordinate (module semantics).
    grid_h / grid_w:   (1, H*W) base grid.
    returns            (1, H*W) sampled values.
    """
    HW = H * W
    f32 = jnp.float32

    gx = off_h_c + grid_h                        # x / width coordinate
    gy = off_w_c + grid_w                        # y / height coordinate
    ix = ((gx + 1.0) * W - 1.0) * 0.5            # un-normalize (align_corners=False)
    iy = ((gy + 1.0) * H - 1.0) * 0.5

    x0f = jnp.floor(ix)
    y0f = jnp.floor(iy)
    wx1 = ix - x0f
    wx0 = 1.0 - wx1
    wy1 = iy - y0f
    wy0 = 1.0 - wy1

    def prep(cf, size):
        valid = ((cf >= 0.0) & (cf <= size - 1.0)).astype(f32)
        idx = jnp.clip(cf, 0.0, size - 1.0).astype(jnp.int32)
        return valid, idx

    vx0, x0 = prep(x0f, W)
    vx1, x1 = prep(x0f + 1.0, W)
    vy0, y0 = prep(y0f, H)
    vy1, y1 = prep(y0f + 1.0, H)

    # Column-select masks over the W (sublane) axis of the row-gather result.
    w_iota = jax.lax.broadcasted_iota(jnp.int32, (W, HW), 0)
    h_iota = jax.lax.broadcasted_iota(jnp.int32, (H, HW), 0)
    mx0 = (w_iota == x0).astype(f32)             # (W, HW)
    mx1 = (w_iota == x1).astype(f32)

    def row_gather(yi):
        onehot = (h_iota == yi).astype(f32)      # (H, HW)
        # rows[w, p] = x[yi[p], w]
        return jnp.dot(x_wh, onehot, preferred_element_type=f32)    # (W, HW)

    rows0 = row_gather(y0)
    v00 = jnp.sum(rows0 * mx0, axis=0, keepdims=True)               # (1, HW)
    v01 = jnp.sum(rows0 * mx1, axis=0, keepdims=True)
    rows1 = row_gather(y1)
    v10 = jnp.sum(rows1 * mx0, axis=0, keepdims=True)
    v11 = jnp.sum(rows1 * mx1, axis=0, keepdims=True)

    return (wy0 * wx0 * vy0 * vx0 * v00 +
            wy0 * wx1 * vy0 * vx1 * v01 +
            wy1 * wx0 * vy1 * vx0 * v10 +
            wy1 * wx1 * vy1 * vx1 * v11)


def _deform_conv_kernel(x_flat_ref, x_t_ref, w_off_ref, w_reg_ref, o_ref,
                        samp_ref, *, C, H, W, roll_sign):
    """Fused forward for one image: offset conv -> grid_sample -> regular conv."""
    HW = H * W
    f32 = jnp.float32

    # 1) offset conv: Conv2d(C, 2C, 3, padding=1, bias=False)
    offs = _conv3x3_flat(x_flat_ref[0], w_off_ref, H=H, W=W, roll_sign=roll_sign)

    # Base sampling grid computed in-kernel (no extra DMA'd inputs).
    lane = jax.lax.broadcasted_iota(jnp.int32, (1, HW), 1)
    h_pix = (lane // W).astype(f32)
    w_pix = (lane % W).astype(f32)
    grid_h = 2.0 * h_pix / (H - 1.0) - 1.0       # np.linspace(-1, 1, H)[h]
    grid_w = 2.0 * w_pix / (W - 1.0) - 1.0       # np.linspace(-1, 1, W)[w]

    # 2) bilinear grid_sample of every channel into VMEM scratch (never to HBM).
    x_t = x_t_ref[0]                             # (C, W, H)
    for c in range(C):                           # static unroll; C is small here
        off_w_c = offs[c:c + 1, :]               # torch.split(offset, C, 1)[0]
        off_h_c = offs[C + c:C + c + 1, :]       # torch.split(offset, C, 1)[1]
        samp_ref[pl.ds(c, 1), :] = _grid_sample_channel(
            x_t[c], off_h_c, off_w_c, grid_h, grid_w, H=H, W=W)

    # 3) regular conv: Conv2d(C, Cout, 3, padding=1); bias is added in the wrapper.
    o_ref[0] = _conv3x3_flat(samp_ref[...], w_reg_ref, H=H, W=W,
                             roll_sign=roll_sign)


# --------------------------------------------------------------------------- #
# Wrapper.
# --------------------------------------------------------------------------- #
def conv2d_deformable_forward(x, offset_weight, regular_weight, regular_bias):
    """Forward pass of Conv2dDeformable.  Call eagerly at least once (the roll
    direction probe runs a tiny eager pallas_call and is then cached)."""
    N, C, H, W = x.shape
    Cout = regular_weight.shape[0]
    HW = H * W
    # Note: demo uses H*W = 256 (multiple of the 128-lane width).
    # TODO(synk): pad the flattened spatial axis for H*W not a multiple of 128.

    roll_sign = _pltpu_roll_sign()

    x_f32 = x.astype(jnp.float32)
    x_flat = x_f32.reshape(N, C, HW)                       # lane-major pixels
    x_t = jnp.swapaxes(x_f32, 2, 3)                        # (N, C, W, H)
    w_off = jnp.transpose(offset_weight.astype(jnp.float32),
                          (2, 3, 0, 1)).reshape(9, 2 * C, C)
    w_reg = jnp.transpose(regular_weight.astype(jnp.float32),
                          (2, 3, 0, 1)).reshape(9, Cout, C)

    kernel = functools.partial(_deform_conv_kernel, C=C, H=H, W=W,
                               roll_sign=roll_sign)

    flops = N * HW * (2 * 9 * (2 * C) * C      # offset conv
                      + 2 * 9 * Cout * C       # regular conv
                      + C * 4 * W * H)         # gather matmuls
    bytes_accessed = 4 * (2 * N * C * HW + 9 * 2 * C * C + 9 * Cout * C
                          + N * Cout * HW)

    out = pl.pallas_call(
        kernel,
        out_shape=jax.ShapeDtypeStruct((N, Cout, HW), jnp.float32),
        grid_spec=pltpu.PrefetchScalarGridSpec(
            num_scalar_prefetch=0,
            grid=(N,),
            in_specs=[
                pl.BlockSpec((1, C, HW), lambda n: (n, 0, 0)),
                pl.BlockSpec((1, C, W, H), lambda n: (n, 0, 0, 0)),
                pl.BlockSpec((9, 2 * C, C), lambda n: (0, 0, 0)),
                pl.BlockSpec((9, Cout, C), lambda n: (0, 0, 0)),
            ],
            out_specs=pl.BlockSpec((1, Cout, HW), lambda n: (n, 0, 0)),
            scratch_shapes=[pltpu.VMEM((C, HW), jnp.float32)],
        ),
        compiler_params=pltpu.CompilerParams(
            dimension_semantics=("parallel",),
            vmem_limit_bytes=32 * 1024 * 1024,
        ),
        cost_estimate=pl.CostEstimate(
            flops=flops, transcendentals=0, bytes_accessed=bytes_accessed),
    )(x_flat, x_t, w_off, w_reg)

    out = out + regular_bias.astype(jnp.float32)[None, :, None]
    return out.reshape(N, Cout, H, W)


# --------------------------------------------------------------------------- #
# Pure-JAX (non-Pallas) reference of the module, used for a self-check.
# --------------------------------------------------------------------------- #
def _reference_forward(x, offset_weight, regular_weight, regular_bias):
    N, C, H, W = x.shape
    conv = functools.partial(
        jax.lax.conv_general_dilated,
        window_strides=(1, 1), padding=((1, 1), (1, 1)),
        dimension_numbers=("NCHW", "OIHW", "NCHW"),
        precision=jax.lax.Precision.HIGHEST)

    offset = conv(x, offset_weight)
    off_w = offset[:, :C].reshape(N * C, H, W)
    off_h = offset[:, C:].reshape(N * C, H, W)

    lin_h = 2.0 * jnp.arange(H, dtype=jnp.float32) / (H - 1.0) - 1.0
    lin_w = 2.0 * jnp.arange(W, dtype=jnp.float32) / (W - 1.0) - 1.0
    gx = off_h + lin_h[None, :, None]          # x coordinate = offset_h + grid_h
    gy = off_w + lin_w[None, None, :]          # y coordinate = offset_w + grid_w

    ix = ((gx + 1.0) * W - 1.0) * 0.5
    iy = ((gy + 1.0) * H - 1.0) * 0.5
    x0 = jnp.floor(ix)
    y0 = jnp.floor(iy)
    maps = x.reshape(N * C, H * W)

    def corner(yc, xc, wgt):
        valid = ((xc >= 0) & (xc <= W - 1) & (yc >= 0) & (yc <= H - 1)).astype(x.dtype)
        xi = jnp.clip(xc, 0, W - 1).astype(jnp.int32)
        yi = jnp.clip(yc, 0, H - 1).astype(jnp.int32)
        idx = (yi * W + xi).reshape(N * C, H * W)
        vals = jnp.take_along_axis(maps, idx, axis=1).reshape(N * C, H, W)
        return wgt * valid * vals

    sampled = (corner(y0, x0, (1 - (iy - y0)) * (1 - (ix - x0))) +
               corner(y0, x0 + 1, (1 - (iy - y0)) * (ix - x0)) +
               corner(y0 + 1, x0, (iy - y0) * (1 - (ix - x0))) +
               corner(y0 + 1, x0 + 1, (iy - y0) * (ix - x0)))
    sampled = sampled.reshape(N, C, H, W)

    out = conv(sampled, regular_weight)
    return out + regular_bias[None, :, None, None]


if __name__ == "__main__":
    key = jax.random.PRNGKey(0)
    k_x, k_off, k_w, k_b = jax.random.split(key, 4)

    N, C, H, W, Cout = 2, 4, 16, 16, 8
    x = jax.random.normal(k_x, (N, C, H, W), dtype=jnp.float32)
    # offset_filter: Conv2d(C, 2C, 3, padding=1, bias=False), weight ~ N(0, 0.0005)
    offset_weight = 0.0005 * jax.random.normal(k_off, (2 * C, C, 3, 3), jnp.float32)
    # regular_filter: Conv2d(C, Cout, 3, padding=1) with bias (synthetic init)
    regular_weight = 0.1 * jax.random.normal(k_w, (Cout, C, 3, 3), jnp.float32)
    regular_bias = 0.1 * jax.random.normal(k_b, (Cout,), jnp.float32)

    out = conv2d_deformable_forward(x, offset_weight, regular_weight, regular_bias)
    out = jax.block_until_ready(out)
    assert out.shape == (N, Cout, H, W) and out.dtype == jnp.float32

    ref = jax.block_until_ready(
        _reference_forward(x, offset_weight, regular_weight, regular_bias))
    assert jnp.allclose(out, ref, atol=1e-3, rtol=1e-3), (
        float(jnp.max(jnp.abs(out - ref))))

    print("KERNEL_OK")
</pallas_src>

<mosaic_0001>
module attributes {stable_mosaic.version = 11 : i64} {
  func.func @_roll_probe_kernel(%arg0: memref<1x128xf32, #tpu.memory_space<vmem>>, %arg1: memref<1x128xf32, #tpu.memory_space<vmem>>) attributes {dimension_semantics = [], scalar_prefetch = 0 : i64, scratch_operands = 0 : i64, tpu.core_type = #tpu.core_type<tc>} {
    %c0 = arith.constant 0 : index
    %c0_0 = arith.constant 0 : index
    %0 = vector.load %arg0[%c0, %c0_0] : memref<1x128xf32, #tpu.memory_space<vmem>>, vector<1x128xf32>
    %c1_i32 = arith.constant 1 : i32
    %1 = tpu.dynamic_rotate %0 by %c1_i32 dim 1 : vector<1x128xf32>, i32 -> vector<1x128xf32>
    %c0_1 = arith.constant 0 : index
    %c0_2 = arith.constant 0 : index
    %2 = vector.load %arg1[%c0_1, %c0_2] : memref<1x128xf32, #tpu.memory_space<vmem>>, vector<1x128xf32>
    tpu.vector_store %arg1[%c0_1, %c0_2], %1 {strides = array<i32>} : memref<1x128xf32, #tpu.memory_space<vmem>>, vector<1x128xf32>,
    return
  }
}

</mosaic_0001>

<bundles_post_ra>
// kernel: tpu_custom_call.1
= control target key start
LH: loop header
LB: loop body
LE: loop exit
PB: predicated region body
PF: predicated region fallthrough
CT: control target
= control target key end

     0   :  { %6 = vsyncpa [#allocation3], 0  ;;  %s118_s0 = inlined_call_operand.hbm [shape: f32[1,128], index: 0, kind: input, shape index: {}]   ;;  %s119_s1 = inlined_call_operand.hbm [shape: f32[1,128], index: 1, kind: output, shape index: {}]  }
   0x1   :  { %7 = vsyncpa [#allocation4], 0  ;;  %s13_s8 = sshll.u32 %s118_s0, 4  ;;  %s99_s9 = smov [#allocation2]   ;;  %s14_s8 = int_to_ptr.hbm [resolvable:$true] %s13_s8 }
   0x2   :  { %s15_s10 = sshll.u32 %s99_s9, 4  ;;  %s16_s10 = int_to_ptr.vmem [resolvable:$true] %s15_s10 }
   0x3   :  { %18 = dma.hbm_to_vmem [thread:$0]  %s14_s8, 16, %s16_s10, [#allocation3]  }
   0x4   :  { %95 = dma.done.wait [#allocation3], 16  }
   0x5   :  { %96 = vsyncadd [#allocation3], 4294967280  ;;  %v23_v0 = vld [vmem:[#allocation2] sm:$0x1]  ;;  %s100_s11 = smov 1   ;;  %s101_s12 = smov [#allocation5]  }
   0x6   :  { %24 = vrot.lane.b32.xlu0 %v23_v0, %s100_s11  ;;  %s32_s13 = sshll.u32 %s101_s12, 4  ;;  %s34_s16 = sshll.u32 %s119_s1, 4  ;;  %s33_s13 = int_to_ptr.vmem [resolvable:$true] %s32_s13  ;;  %s35_s16 = int_to_ptr.hbm [resolvable:$true] %s34_s16 }
  0x78   :  { %v25_v1 = vpop.permute.xlu0 %24 }
  0x79   :  { %26 = vst [vmem:[#allocation5] sm:$0x1] %v25_v1 }
  0x7a   :  { %37 = dma.vmem_to_hbm [thread:$0]  %s33_s13, 16, %s35_s16, [#allocation4]  }
  0x7b   :  { %97 = dma.done.wait [#allocation4], 16  }
  0x7c   :  { %98 = vsyncadd [#allocation4], 4294967280 }
  0x7d   :  { %42 = vsyncpa [#allocation3], 1 }
  0x7e   :  { %43 = vsyncpa [#allocation4], 1 }

</bundles_post_ra>
